<compile_context>
chip_gen: v5e
topology: v5e:2x2
jax: 0.10.0
libtpu: 0.0.40
codegen_flags: <defaults>
</compile_context>

<pallas_src>
import math
import jax
import jax.numpy as jnp
from jax.experimental import pallas as pl
from jax.experimental.pallas import tpu as pltpu

LANE = 128      # TPU lane width (last vreg dim)
SUBLANE = 8     # TPU sublane width (second-to-last vreg dim)


def _round_up(x, m):
    return ((x + m - 1) // m) * m


def _choose_tile_b(batch, max_batch_tile=1024):
    """Batch-tile heuristic (perf-review items 2/3/8):
       - small batch: one tile rounded to the sublane (zero over-padding
         beyond 8-row alignment),
       - large batch: tiles >= 128 rows (full-height MXU pass), >= 2 grid
         steps so the 'parallel' axis can shard across v7x's 2 TensorCores,
         candidate with the fewest padded remainder rows wins (ties go to the
         larger tile to amortize per-grid-step overhead)."""
    b8 = _round_up(batch, SUBLANE)
    if b8 <= 256:
        return b8
    best_tile = 128
    best_waste = _round_up(b8, 128) - b8
    for cand in (256, 512, 1024):
        if cand > max_batch_tile or cand * 2 > b8:
            break
        waste = _round_up(b8, cand) - b8
        if waste <= best_waste:
            best_tile, best_waste = cand, waste
    return best_tile


def _make_mlp_kernel(num_layers, compute_dtype):
    """Fused MLP kernel: chain of (x @ W + b), ReLU on hidden layers only.

    refs = (x_ref, w0, b0, w1, b1, ..., o_ref). Weights are pre-transposed to
    (in, out), so each layer is a plain 2D matmul (no in-kernel transpose).
    Intermediate activations never leave vregs/VMEM.
    """
    def kernel(*refs):
        x_ref = refs[0]
        o_ref = refs[-1]
        wb = refs[1:-1]
        y = x_ref[...]                                   # compute_dtype
        for i in range(num_layers):
            w = wb[2 * i][...]                           # compute_dtype
            b = wb[2 * i + 1][...]                       # f32
            # MXU matmul with f32 accumulation; bias add / ReLU on the VPU in f32.
            y = jnp.dot(y, w, preferred_element_type=jnp.float32) + b
            if i != num_layers - 1:                      # hidden: self.act = relu
                y = jnp.maximum(y, 0.0)
                y = y.astype(compute_dtype)              # back to MXU input dtype
        # output layer: out_act = None (linear)
        o_ref[...] = y.astype(o_ref.dtype)
        # TODO(synk): if tile_b is pushed to 1024 and bundle dumps show spill
        #             vld/vst traffic, route y through a VMEM scratch instead
        #             of carrying it purely as a value (or use the bf16 path).
    return kernel


def init_params(key, layer_sizes):
    """PyTorch nn.Linear init: kaiming_uniform_(a=sqrt(5)) for W (reduces to
    U(-1/sqrt(fan_in), 1/sqrt(fan_in))), same bound for b.
    Weights kept in PyTorch convention (out_f, in_f)."""
    params = []
    for in_f, out_f in zip(layer_sizes[:-1], layer_sizes[1:]):
        key, kw, kb = jax.random.split(key, 3)
        bound = 1.0 / math.sqrt(in_f)
        w = jax.random.uniform(kw, (out_f, in_f), jnp.float32, -bound, bound)
        b = jax.random.uniform(kb, (out_f,), jnp.float32, -bound, bound)
        params.append((w, b))
    return params


def prepare_params(params, compute_dtype=jnp.float32):
    """One-time prep for the fused kernel:
      * transpose W to (in, out) so x's last dim contracts with W's first dim
        (straight onto the MXU, no XLU transpose),
      * layer-0 input dim left UNPADDED (x streams at its real width),
      * hidden dims padded to 128 lanes (lane-dense, VMEM-resident),
      * final output dim left unpadded when out_f < 128 (fewer HBM write
        bytes, no post-kernel feature slice); padded to 128 otherwise,
      * weights cast to compute_dtype (f32 or bf16); biases stay f32 so the
        accumulate / bias add stays f32 even on the bf16 path.
    Zero padding preserves semantics: padded inputs hit zero weight rows,
    padded outputs get bias 0, ReLU(0)=0 feeds zero weights downstream."""
    prepped = []
    n = len(params)
    for li, (w, b) in enumerate(params):
        out_f, in_f = w.shape
        in_p = in_f if li == 0 else _round_up(in_f, LANE)
        if li == n - 1 and out_f < LANE:
            out_p = out_f                       # unpadded output columns
        else:
            out_p = _round_up(out_f, LANE)
        wt = jnp.zeros((in_p, out_p), compute_dtype)
        wt = wt.at[:in_f, :out_f].set(w.T.astype(compute_dtype))
        bp = jnp.zeros((1, out_p), jnp.float32).at[0, :out_f].set(
            b.astype(jnp.float32))
        prepped.append((wt, bp))
    return prepped


def net_forward(x, prepped_params, out_features, max_batch_tile=1024):
    """Forward pass equivalent to Net.forward(x) as one fused pallas_call."""
    batch, in_f = x.shape
    num_layers = len(prepped_params)
    compute_dtype = prepped_params[0][0].dtype
    out_cols = prepped_params[-1][0].shape[1]
    out_dtype = x.dtype

    x_c = x.astype(compute_dtype)

    # Batch tiling (grid over batch, "parallel" so multi-TC chips shard it).
    tile_b = _choose_tile_b(batch, max_batch_tile)
    batch_pad = _round_up(batch, tile_b)
    if batch_pad != batch:
        x_c = jnp.zeros((batch_pad, in_f), compute_dtype).at[:batch].set(x_c)

    # Weight/bias index_maps are constant so the blocks stay VMEM-resident.
    in_specs = [pl.BlockSpec((tile_b, in_f), lambda i: (i, 0))]
    flat_args = [x_c]
    for wt, bp in prepped_params:
        flat_args += [wt, bp]
        in_specs += [
            pl.BlockSpec(wt.shape, lambda i: (0, 0)),
            pl.BlockSpec(bp.shape, lambda i: (0, 0)),
        ]

    # Advisory cost estimate (helps XLA schedule around the custom call).
    flops = 2 * batch_pad * sum(w.shape[0] * w.shape[1]
                                for w, _ in prepped_params)
    bytes_weights = sum(w.size * w.dtype.itemsize + b.size * b.dtype.itemsize
                        for w, b in prepped_params)
    bytes_accessed = (x_c.size * x_c.dtype.itemsize + bytes_weights
                      + batch_pad * out_cols * jnp.dtype(out_dtype).itemsize)

    # Explicit VMEM budget: resident weights + double-buffered x/out tiles,
    # with margin; clamped to stay within v7x's 64 MiB physical VMEM per TC.
    bytes_tiles = tile_b * (in_f * jnp.dtype(compute_dtype).itemsize
                            + out_cols * jnp.dtype(out_dtype).itemsize)
    vmem_need = 2 * (bytes_weights + bytes_tiles)        # default 2x buffering
    vmem_limit = int(min(64 << 20, max(32 << 20, 2 * vmem_need + (4 << 20))))

    out_p = pl.pallas_call(
        _make_mlp_kernel(num_layers, compute_dtype),
        out_shape=jax.ShapeDtypeStruct((batch_pad, out_cols), out_dtype),
        grid=(batch_pad // tile_b,),
        in_specs=in_specs,
        out_specs=pl.BlockSpec((tile_b, out_cols), lambda i: (i, 0)),
        compiler_params=pltpu.CompilerParams(
            dimension_semantics=("parallel",),
            vmem_limit_bytes=vmem_limit),
        cost_estimate=pl.CostEstimate(
            flops=flops, transcendentals=0, bytes_accessed=bytes_accessed),
    )(*flat_args)

    # Feature slice is a no-op when out_cols == out_features (< 128 case);
    # batch slice only trims the padded remainder rows. Fuses under jit.
    return out_p[:batch, :out_features]


if __name__ == "__main__":
    # Small MLP consistent with the module: layer_sizes = [16, 32, 32, 8]
    layer_sizes = [16, 32, 32, 8]
    batch = 4

    key = jax.random.PRNGKey(0)
    key, kx = jax.random.split(key)
    x = jax.random.normal(kx, (batch, layer_sizes[0]), dtype=jnp.float32)

    params = init_params(key, layer_sizes)   # PyTorch-convention (out, in)

    # Pure-JAX reference (original, unpadded math): ReLU on hidden, linear out.
    ref = x
    for i, (w, b) in enumerate(params):
        ref = ref @ w.T + b
        if i != len(params) - 1:
            ref = jnp.maximum(ref, 0.0)

    # --- f32 path: exact parity with the f32 reference ----------------------
    prepped_f32 = prepare_params(params, compute_dtype=jnp.float32)
    fwd_f32 = jax.jit(lambda xx, pp: net_forward(xx, pp, layer_sizes[-1]))
    out_f32 = jax.block_until_ready(fwd_f32(x, prepped_f32))
    assert out_f32.shape == (batch, layer_sizes[-1])
    assert jnp.allclose(out_f32, ref, atol=1e-5, rtol=1e-5)

    # --- bf16 path (review item: bf16-native MXU, f32 accumulate) -----------
    prepped_bf16 = prepare_params(params, compute_dtype=jnp.bfloat16)
    fwd_bf16 = jax.jit(lambda xx, pp: net_forward(xx, pp, layer_sizes[-1]))
    out_bf16 = jax.block_until_ready(fwd_bf16(x, prepped_bf16))
    assert out_bf16.shape == (batch, layer_sizes[-1])
    assert jnp.allclose(out_bf16, ref, atol=3e-2, rtol=3e-2)  # bf16 tolerance

    print("KERNEL_OK")
</pallas_src>

<mosaic_0001>
module attributes {stable_mosaic.version = 11 : i64} {
  func.func @kernel(%arg0: i32, %arg1: memref<8x16xf32, #tpu.memory_space<vmem>>, %arg2: memref<16x128xf32, #tpu.memory_space<vmem>>, %arg3: memref<1x128xf32, #tpu.memory_space<vmem>>, %arg4: memref<128x128xf32, #tpu.memory_space<vmem>>, %arg5: memref<1x128xf32, #tpu.memory_space<vmem>>, %arg6: memref<128x8xf32, #tpu.memory_space<vmem>>, %arg7: memref<1x8xf32, #tpu.memory_space<vmem>>, %arg8: memref<8x8xf32, #tpu.memory_space<vmem>>) attributes {dimension_semantics = [#tpu.dimension_semantics<parallel>], iteration_bounds = array<i64: 1>, scalar_prefetch = 0 : i64, scratch_operands = 0 : i64, tpu.core_type = #tpu.core_type<tc>, window_params = [{transform_indices = @transform_0, window_bounds = array<i64: 8, 16>}, {pipeline_mode = #tpu.pipeline_mode<synchronous>, transform_indices = @transform_1, window_bounds = array<i64: 16, 128>}, {pipeline_mode = #tpu.pipeline_mode<synchronous>, transform_indices = @transform_2, window_bounds = array<i64: 1, 128>}, {pipeline_mode = #tpu.pipeline_mode<synchronous>, transform_indices = @transform_3, window_bounds = array<i64: 128, 128>}, {pipeline_mode = #tpu.pipeline_mode<synchronous>, transform_indices = @transform_4, window_bounds = array<i64: 1, 128>}, {pipeline_mode = #tpu.pipeline_mode<synchronous>, transform_indices = @transform_5, window_bounds = array<i64: 128, 8>}, {pipeline_mode = #tpu.pipeline_mode<synchronous>, transform_indices = @transform_6, window_bounds = array<i64: 1, 8>}, {transform_indices = @transform_7, window_bounds = array<i64: 8, 8>}]} {
    %c0 = arith.constant 0 : index
    %c0_0 = arith.constant 0 : index
    %0 = vector.load %arg1[%c0, %c0_0] : memref<8x16xf32, #tpu.memory_space<vmem>>, vector<8x16xf32>
    %c0_1 = arith.constant 0 : index
    %c0_2 = arith.constant 0 : index
    %1 = vector.load %arg2[%c0_1, %c0_2] : memref<16x128xf32, #tpu.memory_space<vmem>>, vector<16x128xf32>
    %c0_3 = arith.constant 0 : index
    %c0_4 = arith.constant 0 : index
    %2 = vector.load %arg3[%c0_3, %c0_4] : memref<1x128xf32, #tpu.memory_space<vmem>>, vector<1x128xf32>
    %cst = arith.constant dense<0.000000e+00> : vector<8x128xf32>
    %3 = tpu.matmul %0, %1, %cst {dimension_numbers = #tpu.dot_dimension_numbers<[1], [0], [0], [1], [0, 0, 1, 1], [], []>} : vector<8x16xf32>, vector<16x128xf32>, vector<8x128xf32> -> vector<8x128xf32>
    %4 = vector.broadcast %2 : vector<1x128xf32> to vector<8x128xf32>
    %5 = arith.addf %3, %4 : vector<8x128xf32>
    %cst_5 = arith.constant 0.000000e+00 : f32
    %6 = vector.broadcast %cst_5 : f32 to vector<8x128xf32>
    %7 = arith.maximumf %5, %6 : vector<8x128xf32>
    %c0_6 = arith.constant 0 : index
    %c0_7 = arith.constant 0 : index
    %8 = vector.load %arg4[%c0_6, %c0_7] : memref<128x128xf32, #tpu.memory_space<vmem>>, vector<128x128xf32>
    %c0_8 = arith.constant 0 : index
    %c0_9 = arith.constant 0 : index
    %9 = vector.load %arg5[%c0_8, %c0_9] : memref<1x128xf32, #tpu.memory_space<vmem>>, vector<1x128xf32>
    %cst_10 = arith.constant dense<0.000000e+00> : vector<8x128xf32>
    %10 = tpu.matmul %7, %8, %cst_10 {dimension_numbers = #tpu.dot_dimension_numbers<[1], [0], [0], [1], [0, 0, 1, 1], [], []>} : vector<8x128xf32>, vector<128x128xf32>, vector<8x128xf32> -> vector<8x128xf32>
    %11 = vector.broadcast %9 : vector<1x128xf32> to vector<8x128xf32>
    %12 = arith.addf %10, %11 : vector<8x128xf32>
    %cst_11 = arith.constant 0.000000e+00 : f32
    %13 = vector.broadcast %cst_11 : f32 to vector<8x128xf32>
    %14 = arith.maximumf %12, %13 : vector<8x128xf32>
    %c0_12 = arith.constant 0 : index
    %c0_13 = arith.constant 0 : index
    %15 = vector.load %arg6[%c0_12, %c0_13] : memref<128x8xf32, #tpu.memory_space<vmem>>, vector<128x8xf32>
    %c0_14 = arith.constant 0 : index
    %c0_15 = arith.constant 0 : index
    %16 = vector.load %arg7[%c0_14, %c0_15] : memref<1x8xf32, #tpu.memory_space<vmem>>, vector<1x8xf32>
    %cst_16 = arith.constant dense<0.000000e+00> : vector<8x8xf32>
    %17 = tpu.matmul %14, %15, %cst_16 {dimension_numbers = #tpu.dot_dimension_numbers<[1], [0], [0], [1], [0, 0, 1, 1], [], []>} : vector<8x128xf32>, vector<128x8xf32>, vector<8x8xf32> -> vector<8x8xf32>
    %18 = vector.broadcast %16 : vector<1x8xf32> to vector<8x8xf32>
    %19 = arith.addf %17, %18 : vector<8x8xf32>
    %c0_17 = arith.constant 0 : index
    %c0_18 = arith.constant 0 : index
    %20 = vector.load %arg8[%c0_17, %c0_18] : memref<8x8xf32, #tpu.memory_space<vmem>>, vector<8x8xf32>
    tpu.vector_store %arg8[%c0_17, %c0_18], %19 {strides = array<i32>} : memref<8x8xf32, #tpu.memory_space<vmem>>, vector<8x8xf32>,
    return
  }
  func.func @transform_0(%arg0: i32) -> (i32, i32) {
    %c0_i32 = arith.constant 0 : i32
    %c0_i32_0 = arith.constant 0 : i32
    return %arg0, %c0_i32 : i32, i32
  }
  func.func @transform_1(%arg0: i32) -> (i32, i32) {
    %c0_i32 = arith.constant 0 : i32
    %c0_i32_0 = arith.constant 0 : i32
    %c0_i32_1 = arith.constant 0 : i32
    return %c0_i32, %c0_i32_0 : i32, i32
  }
  func.func @transform_2(%arg0: i32) -> (i32, i32) {
    %c0_i32 = arith.constant 0 : i32
    %c0_i32_0 = arith.constant 0 : i32
    %c0_i32_1 = arith.constant 0 : i32
    return %c0_i32, %c0_i32_0 : i32, i32
  }
  func.func @transform_3(%arg0: i32) -> (i32, i32) {
    %c0_i32 = arith.constant 0 : i32
    %c0_i32_0 = arith.constant 0 : i32
    %c0_i32_1 = arith.constant 0 : i32
    return %c0_i32, %c0_i32_0 : i32, i32
  }
  func.func @transform_4(%arg0: i32) -> (i32, i32) {
    %c0_i32 = arith.constant 0 : i32
    %c0_i32_0 = arith.constant 0 : i32
    %c0_i32_1 = arith.constant 0 : i32
    return %c0_i32, %c0_i32_0 : i32, i32
  }
  func.func @transform_5(%arg0: i32) -> (i32, i32) {
    %c0_i32 = arith.constant 0 : i32
    %c0_i32_0 = arith.constant 0 : i32
    %c0_i32_1 = arith.constant 0 : i32
    return %c0_i32, %c0_i32_0 : i32, i32
  }
  func.func @transform_6(%arg0: i32) -> (i32, i32) {
    %c0_i32 = arith.constant 0 : i32
    %c0_i32_0 = arith.constant 0 : i32
    %c0_i32_1 = arith.constant 0 : i32
    return %c0_i32, %c0_i32_0 : i32, i32
  }
  func.func @transform_7(%arg0: i32) -> (i32, i32) {
    %c0_i32 = arith.constant 0 : i32
    %c0_i32_0 = arith.constant 0 : i32
    return %arg0, %c0_i32 : i32, i32
  }
}

</mosaic_0001>

<bundles_post_ra>
// kernel: _lambda_.1
= control target key start
LH: loop header
LB: loop body
LE: loop exit
PB: predicated region body
PF: predicated region fallthrough
CT: control target
= control target key end

     0   :  { %12 = vsyncpa [#allocation3], 0  ;;  %s392_s0 = inlined_call_operand.vmem [shape: f32[8,16], index: 0, kind: input, shape index: {}]   ;;  %s393_s1 = inlined_call_operand.vmem [shape: f32[16,128], index: 1, kind: input, shape index: {}]   ;;  %s394_s2 = inlined_call_operand.hbm [shape: f32[1,128], index: 2, kind: input, shape index: {}]   ;;  %s395_s3 = inlined_call_operand.vmem [shape: f32[128,128], index: 3, kind: input, shape index: {}]   ;;  %s396_s4 = inlined_call_operand.hbm [shape: f32[1,128], index: 4, kind: input, shape index: {}]   ;;  %s397_s5 = inlined_call_operand.vmem [shape: f32[128,8], index: 5, kind: input, shape index: {}]   ;;  %s398_s6 = inlined_call_operand.vmem [shape: f32[1,8], index: 6, kind: input, shape index: {}]   ;;  %s399_s7 = inlined_call_operand.vmem [shape: f32[8,8], index: 7, kind: output, shape index: {}]  }
   0x1   :  { %s23_s26 = sshll.u32 %s394_s2, 4  ;;  %s24_s26 = int_to_ptr.hbm [resolvable:$true] %s23_s26 }
   0x2   :  { %13 = vsyncpa [#allocation5], 0  ;;  %s233_s27 = smov [#allocation2]   ;;  %s36_s8 = sshll.u32 %s396_s4, 4  ;;  %s37_s8 = int_to_ptr.hbm [resolvable:$true] %s36_s8 }
   0x3   :  { %s25_s28 = sshll.u32 %s233_s27, 4  ;;  %s234_s9 = smov [#allocation4]   ;;  %s26_s28 = int_to_ptr.vmem [resolvable:$true] %s25_s28 }
   0x4   :  { %28 = dma.hbm_to_vmem [thread:$0]  %s24_s26, 16, %s26_s28, [#allocation3]  }
   0x5   :  { %s38_s10 = sshll.u32 %s234_s9, 4  ;;  %s39_s10 = int_to_ptr.vmem [resolvable:$true] %s38_s10 }
   0x6   :  { %41 = dma.hbm_to_vmem [thread:$0]  %s37_s8, 16, %s39_s10, [#allocation5]  }
   0x7   :  { %229 = dma.done.wait [#allocation3], 16  }
   0x8   :  { %230 = vsyncadd [#allocation3], 4294967280 }
   0x9   :  { %231 = dma.done.wait [#allocation5], 16  }
   0xa   :  { %232 = vsyncadd [#allocation5], 4294967280  ;;  %v56_v0 = vld [vmem:[%s393_s1 + $0x8] sm:$0xff]  ;;  %v55_v1 = vld [vmem:[%s393_s1] sm:$0xff]  ;;  %vm61_vm0 = vcmask 130048   ;;  %vm167_vm1 = vcmask 64512  }
   0xb   :  { %79 = vmatpush.msra.mxu0 %v56_v0  ;;  %v54_v2 = vld [vmem:[%s392_s0] sm:$0xff]  ;;  %v101_v3 = vld [vmem:[%s395_s3 + $0x78] sm:$0xff]  ;;  %v100_v4 = vld [vmem:[%s395_s3 + $0x70] sm:$0xff] }
   0xc   :  { %106 = vmatpush.msra.mxu1 %v101_v3  ;;  %v99_v5 = vld [vmem:[%s395_s3 + $0x68] sm:$0xff]  ;;  %v98_v6 = vld [vmem:[%s395_s3 + $0x60] sm:$0xff]  ;;  %v97_v7 = vld [vmem:[%s395_s3 + $0x58] sm:$0xff] }
   0xd   :  { %80 = vmatpush.msra.mxu0 %v55_v1  ;;  %v96_v8 = vld [vmem:[%s395_s3 + $0x50] sm:$0xff]  ;;  %v95_v9 = vld [vmem:[%s395_s3 + $0x48] sm:$0xff]  ;;  %v94_v10 = vld [vmem:[%s395_s3 + $0x40] sm:$0xff] }
   0xe   :  { %175 = vmatmul.msk.f32.vlgmr.msra.gmra.mxu0 %vm61_vm0, %v54_v2  ;;  %107 = vmatpush.msra.mxu1 %v100_v4  ;;  %v93_v11 = vld [vmem:[%s395_s3 + $0x38] sm:$0xff]  ;;  %v92_v12 = vld [vmem:[%s395_s3 + $0x30] sm:$0xff]  ;;  %v91_v13 = vld [vmem:[%s395_s3 + $0x28] sm:$0xff] }
   0xf   :  { %v90_v14 = vld [vmem:[%s395_s3 + $0x20] sm:$0xff]  ;;  %v89_v15 = vld [vmem:[%s395_s3 + $0x18] sm:$0xff]  ;;  %v88_v16 = vld [vmem:[%s395_s3 + $0x10] sm:$0xff] }
  0x10   :  { %108 = vmatpush.msra.mxu1 %v99_v5  ;;  %v87_v17 = vld [vmem:[%s395_s3 + $0x8] sm:$0xff]  ;;  %v86_v18 = vld [vmem:[%s395_s3] sm:$0xff]  ;;  %v142_v19 = vld [vmem:[%s397_s5 + $0x78] sm:$0xff] }
  0x11   :  { %v141_v20 = vld [vmem:[%s397_s5 + $0x70] sm:$0xff]  ;;  %147 = vmatpush.msra.mxu2 %v142_v19  ;;  %v140_v21 = vld [vmem:[%s397_s5 + $0x68] sm:$0xff]  ;;  %v139_v22 = vld [vmem:[%s397_s5 + $0x60] sm:$0xff] }
  0x12   :  { %109 = vmatpush.msra.mxu1 %v98_v6  ;;  %v138_v23 = vld [vmem:[%s397_s5 + $0x58] sm:$0xff]  ;;  %v137_v24 = vld [vmem:[%s397_s5 + $0x50] sm:$0xff]  ;;  %v136_v25 = vld [vmem:[%s397_s5 + $0x48] sm:$0xff] }
  0x13   :  { %148 = vmatpush.msra.mxu2 %v141_v20  ;;  %v135_v26 = vld [vmem:[%s397_s5 + $0x40] sm:$0xff]  ;;  %v134_v27 = vld [vmem:[%s397_s5 + $0x38] sm:$0xff]  ;;  %v133_v28 = vld [vmem:[%s397_s5 + $0x30] sm:$0xff] }
  0x14   :  { %110 = vmatpush.msra.mxu1 %v97_v7  ;;  %v132_v29 = vld [vmem:[%s397_s5 + $0x28] sm:$0xff]  ;;  %v131_v30 = vld [vmem:[%s397_s5 + $0x20] sm:$0xff]  ;;  %v130_v31 = vld [vmem:[%s397_s5 + $0x18] sm:$0xff] }
  0x15   :  { %149 = vmatpush.msra.mxu2 %v140_v21  ;;  %v178_v32 = vld [vmem:[#allocation2] ss:$0 sm:$0xff]  ;;  %v129_v36 = vld [vmem:[%s397_s5 + $0x10] sm:$0xff]  ;;  %v128_v37 = vld [vmem:[%s397_s5 + $0x8] sm:$0xff] }
  0x16   :  { %111 = vmatpush.msra.mxu1 %v96_v8  ;;  %v127_v38 = vld [vmem:[%s397_s5] sm:$0xff] }
  0x17   :  { %150 = vmatpush.msra.mxu2 %v139_v22  ;;  %v179_v39 = vld [vmem:[#allocation4] ss:$0 sm:$0xff]  ;;  %v180_v43 = vld [vmem:[%s398_s6] ss:$0 sm:$0xff] }
  0x18   :  { %112 = vmatpush.msra.mxu1 %v95_v9 }
  0x19   :  { %151 = vmatpush.msra.mxu2 %v138_v23 }
  0x1a   :  { %113 = vmatpush.msra.mxu1 %v94_v10 }
  0x1b   :  { %152 = vmatpush.msra.mxu2 %v137_v24 }
  0x1c   :  { %114 = vmatpush.msra.mxu1 %v93_v11 }
  0x1d   :  { %153 = vmatpush.msra.mxu2 %v136_v25 }
  0x1e   :  { %115 = vmatpush.msra.mxu1 %v92_v12 }
  0x1f   :  { %154 = vmatpush.msra.mxu2 %v135_v26 }
  0x20   :  { %116 = vmatpush.msra.mxu1 %v91_v13 }
  0x21   :  { %155 = vmatpush.msra.mxu2 %v134_v27 }
  0x22   :  { %117 = vmatpush.msra.mxu1 %v90_v14 }
  0x23   :  { %156 = vmatpush.msra.mxu2 %v133_v28 }
  0x24   :  { %118 = vmatpush.msra.mxu1 %v89_v15 }
  0x25   :  { %157 = vmatpush.msra.mxu2 %v132_v29 }
  0x26   :  { %119 = vmatpush.msra.mxu1 %v88_v16 }
  0x27   :  { %158 = vmatpush.msra.mxu2 %v131_v30 }
  0x28   :  { %120 = vmatpush.msra.mxu1 %v87_v17 }
  0x29   :  { %159 = vmatpush.msra.mxu2 %v130_v31 }
  0x2a   :  { %121 = vmatpush.msra.mxu1 %v86_v18 }
  0x2b   :  { %160 = vmatpush.msra.mxu2 %v129_v36 }
  0x2d   :  { %161 = vmatpush.msra.mxu2 %v128_v37 }
  0x2f   :  { %162 = vmatpush.msra.mxu2 %v127_v38 }
  0x8b   :  { %v82_v33 = vpop.f32.mrf.mxu0 }
  0x8c   :  { %v83_v34 = vadd.f32 %v178_v32, %v82_v33 }
  0x8e   :  { %v85_v35 = vmax.f32 %v83_v34, 0.0 }
  0x90   :  { %122 = vmatmul.f32.vlgmr.msra.gmra.mxu1 %v85_v35 }
 0x10d   :  { %v123_v40 = vpop.f32.mrf.mxu1 }
 0x10e   :  { %v124_v41 = vadd.f32 %v179_v39, %v123_v40 }
 0x110   :  { %v126_v42 = vmax.f32 %v124_v41, 0.0 }
 0x112   :  { %163 = vmatmul.f32.vlgmr.msra.gmra.mxu2 %v126_v42 }
 0x195   :  { %v164_v44 = vpop.f32.mrf.mxu2 }
 0x196   :  { %v165_v45 = vadd.f32 %v180_v43, %v164_v44 }
 0x198   :  { %168 = vst.msk [vmem:[%s399_s7] sm:$0xff] %vm167_vm1, %v165_v45 }
 0x199   :  { %173 = vsyncpa [#allocation3], 1 }
 0x19a   :  { %174 = vsyncpa [#allocation5], 1 }

</bundles_post_ra>
